<compile_context>
chip_gen: v7x
topology: tpu7x:2x2x1
jax: 0.10.0
libtpu: 0.0.40
codegen_flags: <defaults>
</compile_context>

<pallas_src>
import jax
import jax.numpy as jnp
from jax.experimental import pallas as pl
from jax.experimental.pallas import tpu as pltpu

LANE = 128          # lane-dense padded width of the classifier head
NEG_INF = -1e30     # mask value for padded logits


# -----------------------------------------------------------------------------
# Pallas kernel: whole SAGE forward on VMEM-resident tiles
# -----------------------------------------------------------------------------
def sage_forward_kernel(
    a_ref,                    # (N, N)   bf16 row-normalized adjacency
    x_ref,                    # (N, Cin) f32 node features
    w1_ref, b1_ref,           # conv1 fused: (2*Cin, H) bf16, (1, H) f32
    w2_ref, b2_ref,           # conv2 fused: (2*H, H)  bf16, (1, H) f32
    w3_ref, b3_ref,           # conv3 fused: (2*H, H)  bf16, (1, H) f32
    wfc_ref, bfc_ref,         # fc padded:   (H, LANE) bf16, (1, LANE) f32 (-1e30 in pads)
    out_ref,                  # (N, LANE) f32 softmax probabilities (padded lanes ~0)
):
    a = a_ref[...]
    h = x_ref[...]

    def sage_layer(h, w, b):
        # mean aggregation of neighbors == A_norm @ h (MXU, bf16 in / f32 accumulate)
        agg = jnp.dot(a, h.astype(jnp.bfloat16), preferred_element_type=jnp.float32)
        # fused lin_l(agg) + lin_r(h): one MXU matmul against row-concatenated weights
        z = jnp.concatenate([agg, h], axis=-1).astype(jnp.bfloat16)
        out = jnp.dot(z, w, preferred_element_type=jnp.float32) + b
        # F.normalize(out, p=2, dim=-1); clamp-at-1e-12 == rsqrt(max(ss, 1e-24))  (EUP)
        ss = jnp.sum(out * out, axis=-1, keepdims=True)
        return out * jax.lax.rsqrt(jnp.maximum(ss, 1e-24))

    h = sage_layer(h, w1_ref[...], b1_ref[...])
    h = jnp.maximum(h, 0.0)                       # ReLU (Dropout = identity in eval)
    h = sage_layer(h, w2_ref[...], b2_ref[...])
    h = jnp.maximum(h, 0.0)                       # ReLU (Dropout = identity in eval)
    h = sage_layer(h, w3_ref[...], b3_ref[...])

    # fc + softmax(dim=-1) over the lane-dense padded head (padded logits carry -1e30)
    logits = (jnp.dot(h.astype(jnp.bfloat16), wfc_ref[...],
                      preferred_element_type=jnp.float32) + bfc_ref[...])
    m = jnp.max(logits, axis=-1, keepdims=True)
    e = jnp.exp(logits - m)
    denom = jnp.sum(e, axis=-1, keepdims=True)
    out_ref[...] = e * pl.reciprocal(denom, approx=True)


# -----------------------------------------------------------------------------
# Plain-JAX glue: dense normalized adjacency, weight packing, pallas_call wrapper
# -----------------------------------------------------------------------------
def build_mean_adjacency(edge_index, num_nodes):
    """edge_index: (2, E) int32, row 0 = source j, row 1 = target i.
    A[i, j] = 1/in_deg(i) per edge j->i (zero rows for isolated nodes),
    matching PyG scatter-mean aggregation."""
    src = edge_index[0]
    dst = edge_index[1]
    counts = jnp.zeros((num_nodes, num_nodes), jnp.float32).at[dst, src].add(1.0)
    deg = jnp.sum(counts, axis=1, keepdims=True)
    return jnp.where(deg > 0, counts / jnp.maximum(deg, 1.0), 0.0)


def _pack_params(params):
    """Fuse lin_l/lin_r row-wise, cast matmul weights to bf16, pad fc head to LANE."""
    def fuse(wl, wr):
        return jnp.concatenate([wl, wr], axis=0).astype(jnp.bfloat16)

    h, o = params["wfc"].shape
    wfc = jnp.zeros((h, LANE), jnp.float32).at[:, :o].set(params["wfc"]).astype(jnp.bfloat16)
    bfc = jnp.full((1, LANE), NEG_INF, jnp.float32).at[:, :o].set(params["bfc"][0])
    return (
        fuse(params["wl1"], params["wr1"]), params["bl1"],
        fuse(params["wl2"], params["wr2"]), params["bl2"],
        fuse(params["wl3"], params["wr3"]), params["bl3"],
        wfc, bfc,
    )


@jax.jit
def sage_forward(a, x, params):
    n, cin = x.shape
    hid = params["wl1"].shape[1]
    o = params["wfc"].shape[1]

    operands = (a.astype(jnp.bfloat16), x) + _pack_params(params)

    # Advisory cost / memory hints for the XLA scheduler.
    bytes_accessed = sum(int(op.size) * op.dtype.itemsize for op in operands) + n * LANE * 4
    flops = 2 * n * n * (cin + 2 * hid) + 2 * n * (2 * cin * hid + 4 * hid * hid + hid * LANE)
    transcendentals = n * (LANE + 4)   # exp rows + rsqrt/recip per row
    vmem_limit = int(max(4 * 1024 * 1024, 8 * bytes_accessed))

    vmem_spec = pl.BlockSpec(memory_space=pltpu.MemorySpace.VMEM)
    # NOTE: gridless whole-array VMEM residency is appropriate at N=64. For large N,
    # switch to a ("parallel",) row-tile grid over A (BlockSpec (tm, N)) to engage
    # both v7x TensorCores and stay under its 64 MiB VMEM.
    out_padded = pl.pallas_call(
        sage_forward_kernel,
        out_shape=jax.ShapeDtypeStruct((n, LANE), jnp.float32),
        in_specs=[vmem_spec] * len(operands),
        out_specs=vmem_spec,
        cost_estimate=pl.CostEstimate(
            flops=flops, transcendentals=transcendentals, bytes_accessed=bytes_accessed),
        compiler_params=pltpu.CompilerParams(vmem_limit_bytes=vmem_limit),
    )(*operands)
    return out_padded[:, :o]


# -----------------------------------------------------------------------------
# Deterministic parameter init (xavier_uniform for weights, zeros for biases)
# -----------------------------------------------------------------------------
def xavier_uniform(key, fan_in, fan_out):
    bound = jnp.sqrt(6.0 / (fan_in + fan_out))
    # stored as (fan_in, fan_out) so the kernel computes x @ W directly
    return jax.random.uniform(key, (fan_in, fan_out), jnp.float32, -bound, bound)


def init_params(key, in_channels, hidden_channels, out_channels):
    ks = jax.random.split(key, 7)
    return {
        "wl1": xavier_uniform(ks[0], in_channels, hidden_channels),
        "bl1": jnp.zeros((1, hidden_channels), jnp.float32),
        "wr1": xavier_uniform(ks[1], in_channels, hidden_channels),
        "wl2": xavier_uniform(ks[2], hidden_channels, hidden_channels),
        "bl2": jnp.zeros((1, hidden_channels), jnp.float32),
        "wr2": xavier_uniform(ks[3], hidden_channels, hidden_channels),
        "wl3": xavier_uniform(ks[4], hidden_channels, hidden_channels),
        "bl3": jnp.zeros((1, hidden_channels), jnp.float32),
        "wr3": xavier_uniform(ks[5], hidden_channels, hidden_channels),
        "wfc": xavier_uniform(ks[6], hidden_channels, out_channels),
        "bfc": jnp.zeros((1, out_channels), jnp.float32),
    }


if __name__ == "__main__":
    N, E = 64, 256
    IN_C, HID_C, OUT_C = 16, 32, 8

    key = jax.random.PRNGKey(0)
    k_x, k_src, k_dst, k_params = jax.random.split(key, 4)

    x = jax.random.normal(k_x, (N, IN_C), jnp.float32)
    edge_index = jnp.stack(
        [
            jax.random.randint(k_src, (E,), 0, N, jnp.int32),
            jax.random.randint(k_dst, (E,), 0, N, jnp.int32),
        ],
        axis=0,
    )
    params = init_params(k_params, IN_C, HID_C, OUT_C)

    a = build_mean_adjacency(edge_index, N)
    probs = sage_forward(a, x, params)
    jax.block_until_ready(probs)

    assert probs.shape == (N, OUT_C)
    # sanity: rows of softmax output sum to ~1 (approx EUP reciprocal => loose tol)
    assert bool(jnp.all(jnp.abs(jnp.sum(probs, axis=-1) - 1.0) < 5e-3))
    assert bool(jnp.all(probs >= 0.0))
    print("KERNEL_OK")
</pallas_src>

<mosaic_0001>
module attributes {stable_mosaic.version = 11 : i64} {
  func.func @sage_forward_kernel(%arg0: memref<64x64xbf16, #tpu.memory_space<vmem>>, %arg1: memref<64x16xf32, #tpu.memory_space<vmem>>, %arg2: memref<32x32xbf16, #tpu.memory_space<vmem>>, %arg3: memref<1x32xf32, #tpu.memory_space<vmem>>, %arg4: memref<64x32xbf16, #tpu.memory_space<vmem>>, %arg5: memref<1x32xf32, #tpu.memory_space<vmem>>, %arg6: memref<64x32xbf16, #tpu.memory_space<vmem>>, %arg7: memref<1x32xf32, #tpu.memory_space<vmem>>, %arg8: memref<32x128xbf16, #tpu.memory_space<vmem>>, %arg9: memref<1x128xf32, #tpu.memory_space<vmem>>, %arg10: memref<64x128xf32, #tpu.memory_space<vmem>>) attributes {dimension_semantics = [], scalar_prefetch = 0 : i64, scratch_operands = 0 : i64, tpu.core_type = #tpu.core_type<tc>} {
    %c0 = arith.constant 0 : index
    %c0_0 = arith.constant 0 : index
    %0 = vector.load %arg0[%c0, %c0_0] : memref<64x64xbf16, #tpu.memory_space<vmem>>, vector<64x64xbf16>
    %c0_1 = arith.constant 0 : index
    %c0_2 = arith.constant 0 : index
    %1 = vector.load %arg1[%c0_1, %c0_2] : memref<64x16xf32, #tpu.memory_space<vmem>>, vector<64x16xf32>
    %c0_3 = arith.constant 0 : index
    %c0_4 = arith.constant 0 : index
    %2 = vector.load %arg2[%c0_3, %c0_4] : memref<32x32xbf16, #tpu.memory_space<vmem>>, vector<32x32xbf16>
    %c0_5 = arith.constant 0 : index
    %c0_6 = arith.constant 0 : index
    %3 = vector.load %arg3[%c0_5, %c0_6] : memref<1x32xf32, #tpu.memory_space<vmem>>, vector<1x32xf32>
    %4 = arith.truncf %1 : vector<64x16xf32> to vector<64x16xbf16>
    %cst = arith.constant dense<0.000000e+00> : vector<64x16xf32>
    %5 = tpu.matmul %0, %4, %cst {dimension_numbers = #tpu.dot_dimension_numbers<[1], [0], [0], [1], [0, 0, 1, 1], [], []>} : vector<64x64xbf16>, vector<64x16xbf16>, vector<64x16xf32> -> vector<64x16xf32>
    %6 = tpu.concatenate %5, %1 in 1 : vector<64x16xf32>, vector<64x16xf32> -> vector<64x32xf32>
    %7 = arith.truncf %6 : vector<64x32xf32> to vector<64x32xbf16>
    %cst_7 = arith.constant dense<0.000000e+00> : vector<64x32xf32>
    %8 = tpu.matmul %7, %2, %cst_7 {dimension_numbers = #tpu.dot_dimension_numbers<[1], [0], [0], [1], [0, 0, 1, 1], [], []>} : vector<64x32xbf16>, vector<32x32xbf16>, vector<64x32xf32> -> vector<64x32xf32>
    %9 = vector.broadcast %3 : vector<1x32xf32> to vector<64x32xf32>
    %10 = arith.addf %8, %9 : vector<64x32xf32>
    %11 = arith.mulf %10, %10 : vector<64x32xf32>
    %cst_8 = arith.constant dense<0.000000e+00> : vector<64xf32>
    %12 = vector.multi_reduction <add>, %11, %cst_8 [1] : vector<64x32xf32> to vector<64xf32>
    %13 = vector.shape_cast %12 : vector<64xf32> to vector<64x1xf32>
    %cst_9 = arith.constant 1.000000e-24 : f32
    %14 = vector.broadcast %cst_9 : f32 to vector<64x1xf32>
    %15 = arith.maximumf %13, %14 : vector<64x1xf32>
    %16 = math.rsqrt %15 : vector<64x1xf32>
    %17 = vector.broadcast %16 : vector<64x1xf32> to vector<64x32xf32>
    %18 = arith.mulf %10, %17 : vector<64x32xf32>
    %cst_10 = arith.constant 0.000000e+00 : f32
    %19 = vector.broadcast %cst_10 : f32 to vector<64x32xf32>
    %20 = arith.maximumf %18, %19 : vector<64x32xf32>
    %c0_11 = arith.constant 0 : index
    %c0_12 = arith.constant 0 : index
    %21 = vector.load %arg4[%c0_11, %c0_12] : memref<64x32xbf16, #tpu.memory_space<vmem>>, vector<64x32xbf16>
    %c0_13 = arith.constant 0 : index
    %c0_14 = arith.constant 0 : index
    %22 = vector.load %arg5[%c0_13, %c0_14] : memref<1x32xf32, #tpu.memory_space<vmem>>, vector<1x32xf32>
    %23 = arith.truncf %20 : vector<64x32xf32> to vector<64x32xbf16>
    %cst_15 = arith.constant dense<0.000000e+00> : vector<64x32xf32>
    %24 = tpu.matmul %0, %23, %cst_15 {dimension_numbers = #tpu.dot_dimension_numbers<[1], [0], [0], [1], [0, 0, 1, 1], [], []>} : vector<64x64xbf16>, vector<64x32xbf16>, vector<64x32xf32> -> vector<64x32xf32>
    %25 = tpu.concatenate %24, %20 in 1 : vector<64x32xf32>, vector<64x32xf32> -> vector<64x64xf32>
    %26 = arith.truncf %25 : vector<64x64xf32> to vector<64x64xbf16>
    %cst_16 = arith.constant dense<0.000000e+00> : vector<64x32xf32>
    %27 = tpu.matmul %26, %21, %cst_16 {dimension_numbers = #tpu.dot_dimension_numbers<[1], [0], [0], [1], [0, 0, 1, 1], [], []>} : vector<64x64xbf16>, vector<64x32xbf16>, vector<64x32xf32> -> vector<64x32xf32>
    %28 = vector.broadcast %22 : vector<1x32xf32> to vector<64x32xf32>
    %29 = arith.addf %27, %28 : vector<64x32xf32>
    %30 = arith.mulf %29, %29 : vector<64x32xf32>
    %cst_17 = arith.constant dense<0.000000e+00> : vector<64xf32>
    %31 = vector.multi_reduction <add>, %30, %cst_17 [1] : vector<64x32xf32> to vector<64xf32>
    %32 = vector.shape_cast %31 : vector<64xf32> to vector<64x1xf32>
    %cst_18 = arith.constant 1.000000e-24 : f32
    %33 = vector.broadcast %cst_18 : f32 to vector<64x1xf32>
    %34 = arith.maximumf %32, %33 : vector<64x1xf32>
    %35 = math.rsqrt %34 : vector<64x1xf32>
    %36 = vector.broadcast %35 : vector<64x1xf32> to vector<64x32xf32>
    %37 = arith.mulf %29, %36 : vector<64x32xf32>
    %cst_19 = arith.constant 0.000000e+00 : f32
    %38 = vector.broadcast %cst_19 : f32 to vector<64x32xf32>
    %39 = arith.maximumf %37, %38 : vector<64x32xf32>
    %c0_20 = arith.constant 0 : index
    %c0_21 = arith.constant 0 : index
    %40 = vector.load %arg6[%c0_20, %c0_21] : memref<64x32xbf16, #tpu.memory_space<vmem>>, vector<64x32xbf16>
    %c0_22 = arith.constant 0 : index
    %c0_23 = arith.constant 0 : index
    %41 = vector.load %arg7[%c0_22, %c0_23] : memref<1x32xf32, #tpu.memory_space<vmem>>, vector<1x32xf32>
    %42 = arith.truncf %39 : vector<64x32xf32> to vector<64x32xbf16>
    %cst_24 = arith.constant dense<0.000000e+00> : vector<64x32xf32>
    %43 = tpu.matmul %0, %42, %cst_24 {dimension_numbers = #tpu.dot_dimension_numbers<[1], [0], [0], [1], [0, 0, 1, 1], [], []>} : vector<64x64xbf16>, vector<64x32xbf16>, vector<64x32xf32> -> vector<64x32xf32>
    %44 = tpu.concatenate %43, %39 in 1 : vector<64x32xf32>, vector<64x32xf32> -> vector<64x64xf32>
    %45 = arith.truncf %44 : vector<64x64xf32> to vector<64x64xbf16>
    %cst_25 = arith.constant dense<0.000000e+00> : vector<64x32xf32>
    %46 = tpu.matmul %45, %40, %cst_25 {dimension_numbers = #tpu.dot_dimension_numbers<[1], [0], [0], [1], [0, 0, 1, 1], [], []>} : vector<64x64xbf16>, vector<64x32xbf16>, vector<64x32xf32> -> vector<64x32xf32>
    %47 = vector.broadcast %41 : vector<1x32xf32> to vector<64x32xf32>
    %48 = arith.addf %46, %47 : vector<64x32xf32>
    %49 = arith.mulf %48, %48 : vector<64x32xf32>
    %cst_26 = arith.constant dense<0.000000e+00> : vector<64xf32>
    %50 = vector.multi_reduction <add>, %49, %cst_26 [1] : vector<64x32xf32> to vector<64xf32>
    %51 = vector.shape_cast %50 : vector<64xf32> to vector<64x1xf32>
    %cst_27 = arith.constant 1.000000e-24 : f32
    %52 = vector.broadcast %cst_27 : f32 to vector<64x1xf32>
    %53 = arith.maximumf %51, %52 : vector<64x1xf32>
    %54 = math.rsqrt %53 : vector<64x1xf32>
    %55 = vector.broadcast %54 : vector<64x1xf32> to vector<64x32xf32>
    %56 = arith.mulf %48, %55 : vector<64x32xf32>
    %57 = arith.truncf %56 : vector<64x32xf32> to vector<64x32xbf16>
    %c0_28 = arith.constant 0 : index
    %c0_29 = arith.constant 0 : index
    %58 = vector.load %arg8[%c0_28, %c0_29] : memref<32x128xbf16, #tpu.memory_space<vmem>>, vector<32x128xbf16>
    %cst_30 = arith.constant dense<0.000000e+00> : vector<64x128xf32>
    %59 = tpu.matmul %57, %58, %cst_30 {dimension_numbers = #tpu.dot_dimension_numbers<[1], [0], [0], [1], [0, 0, 1, 1], [], []>} : vector<64x32xbf16>, vector<32x128xbf16>, vector<64x128xf32> -> vector<64x128xf32>
    %c0_31 = arith.constant 0 : index
    %c0_32 = arith.constant 0 : index
    %60 = vector.load %arg9[%c0_31, %c0_32] : memref<1x128xf32, #tpu.memory_space<vmem>>, vector<1x128xf32>
    %61 = vector.broadcast %60 : vector<1x128xf32> to vector<64x128xf32>
    %62 = arith.addf %59, %61 : vector<64x128xf32>
    %cst_33 = arith.constant dense<0xFF800000> : vector<64xf32>
    %63 = vector.multi_reduction <maximumf>, %62, %cst_33 [1] : vector<64x128xf32> to vector<64xf32>
    %64 = vector.shape_cast %63 : vector<64xf32> to vector<64x1xf32>
    %65 = vector.broadcast %64 : vector<64x1xf32> to vector<64x128xf32>
    %66 = arith.subf %62, %65 : vector<64x128xf32>
    %67 = math.exp %66 : vector<64x128xf32>
    %cst_34 = arith.constant dense<0.000000e+00> : vector<64xf32>
    %68 = vector.multi_reduction <add>, %67, %cst_34 [1] : vector<64x128xf32> to vector<64xf32>
    %69 = vector.shape_cast %68 : vector<64xf32> to vector<64x1xf32>
    %70 = tpu.reciprocal %69 {approx = true} : vector<64x1xf32> -> vector<64x1xf32>
    %71 = vector.broadcast %70 : vector<64x1xf32> to vector<64x128xf32>
    %72 = arith.mulf %67, %71 : vector<64x128xf32>
    %c0_35 = arith.constant 0 : index
    %c0_36 = arith.constant 0 : index
    %73 = vector.load %arg10[%c0_35, %c0_36] : memref<64x128xf32, #tpu.memory_space<vmem>>, vector<64x128xf32>
    tpu.vector_store %arg10[%c0_35, %c0_36], %72 {strides = array<i32>} : memref<64x128xf32, #tpu.memory_space<vmem>>, vector<64x128xf32>,
    return
  }
}

</mosaic_0001>

<bundles_post_ra>
// kernel: sage_forward.1
= control target key start
LH: loop header
LB: loop body
LE: loop exit
PB: predicated region body
PF: predicated region fallthrough
CT: control target
= control target key end

     0   :  { %vm81_vm0 = vcmask 523264   ;;  %s1492_s11 = smov 16   ;;  %vm191_vm1 = vcmask 130048   ;;  %vm222_vm2 = vcmask 261120   ;;  %s1861_s1 = inlined_call_operand.vmem [shape: f32[64,16], index: 1, kind: input, shape index: {}]   ;;  %s1862_s0 = inlined_call_operand.vmem [shape: bf16[64,64], index: 0, kind: input, shape index: {}]   ;;  %s1863_s2 = inlined_call_operand.vmem [shape: bf16[32,32], index: 2, kind: input, shape index: {}]   ;;  %s1864_s3 = inlined_call_operand.vmem [shape: f32[1,32], index: 3, kind: input, shape index: {}]   ;;  %s1865_s4 = inlined_call_operand.vmem [shape: bf16[64,32], index: 4, kind: input, shape index: {}]   ;;  %s1866_s5 = inlined_call_operand.vmem [shape: f32[1,32], index: 5, kind: input, shape index: {}]   ;;  %s1867_s6 = inlined_call_operand.vmem [shape: bf16[64,32], index: 6, kind: input, shape index: {}]   ;;  %s1868_s7 = inlined_call_operand.vmem [shape: f32[1,32], index: 7, kind: input, shape index: {}]   ;;  %s1869_s8 = inlined_call_operand.vmem [shape: bf16[32,128], index: 8, kind: input, shape index: {}]   ;;  %s1870_s9 = inlined_call_operand.vmem [shape: f32[1,128], index: 9, kind: input, shape index: {}]   ;;  %s1871_s10 = inlined_call_operand.vmem [shape: f32[64,128], index: 10, kind: output, shape index: {}]  }
   0x1   :  { %v44_v0 = vld [vmem:[%s1861_s1] sm:$0xff]  ;;  %v45_v1 = vld [vmem:[%s1861_s1 + $0x8] sm:$0xff]  ;;  %v46_v2 = vld [vmem:[%s1861_s1 + $0x10] sm:$0xff] }
   0x2   :  { %v57_v3 = vpack.c.bf16 %v45_v1, %v44_v0  ;;  %v47_v4 = vld [vmem:[%s1861_s1 + $0x18] sm:$0xff]  ;;  %v48_v5 = vld [vmem:[%s1861_s1 + $0x20] sm:$0xff]  ;;  %v49_v6 = vld [vmem:[%s1861_s1 + $0x28] sm:$0xff]  ;;  %v1336_v7 = vpack.i.bf16 %v45_v1, %v44_v0 }
   0x3   :  { %v58_v8 = vpack.c.bf16 %v47_v4, %v46_v2  ;;  %v50_v9 = vld [vmem:[%s1861_s1 + $0x30] sm:$0xff]  ;;  %v51_v10 = vld [vmem:[%s1861_s1 + $0x38] sm:$0xff]  ;;  %v1346_v11 = vpack.i.bf16 %v49_v6, %v48_v5  ;;  %v1576_v12 = vld [vmem:[%s1862_s0] sm:$0xff]   ;;  %v1341_v13 = vpack.i.bf16 %v47_v4, %v46_v2  ;;  %v59_v15 = vpack.c.bf16 %v49_v6, %v48_v5 }
   0x4   :  { %1230 = vmatprep.subr.bf16.mxu0 %v57_v3  ;;  %1337 = vrot.lane.b32.xlu0 %v1336_v7, %s1492_s11  ;;  %v1351_v14 = vpack.i.bf16 %v51_v10, %v50_v9  ;;  %v60_v16 = vpack.c.bf16 %v51_v10, %v50_v9  ;;  %v1583_v17 = vld [vmem:[%s1862_s0 + $0x8] sm:$0xff]   ;;  %v1588_v18 = vld [vmem:[%s1862_s0 + $0x10] sm:$0xff]   ;;  %v1597_v19 = vld [vmem:[%s1862_s0 + $0x18] sm:$0xff]  }
   0x5   :  { %1231 = vmatpush3.bf16.msra.mxu0 %v57_v3  ;;  %1347 = vrot.lane.b32.xlu1 %v1346_v11, %s1492_s11  ;;  %v1400_v20 = vld [vmem:[%s1863_s2] sm:$0xff]   ;;  %v1401_v21 = vld [vmem:[%s1863_s2 + $0x8] sm:$0xff]  }
   0x6   :  { %1232 = vmatprep.subr.bf16.mxu0 %v58_v8  ;;  %1238 = vmatprep.mubr.msk.bf16.mxu0 %vm81_vm0, %v1576_v12  ;;  %v1138_v54 = vld [vmem:[%s1864_s3] ss:$0 sm:$0xff]  ;;  %s1493_s3 = smov 32  }
   0x7   :  { %1246 = vmatprep.subr.bf16.mxu1 %v1400_v20 }
   0x8   :  { %1342 = vrot.lane.b32.xlu0 %v1341_v13, %s1492_s11  ;;  %1247 = vmatpush3.bf16.msra.mxu1 %v1400_v20 }
   0x9   :  { %1233 = vmatpush3.bf16.msra.mxu0 %v58_v8  ;;  %1352 = vrot.lane.b32.xlu1 %v1351_v14, %s1492_s11 }
   0xa   :  { %1234 = vmatprep.subr.bf16.mxu0 %v59_v15  ;;  %1248 = vmatprep.subr.bf16.mxu1 %v1401_v21 }
   0xc   :  { %1249 = vmatpush3.bf16.msra.mxu1 %v1401_v21 }
   0xd   :  { %1235 = vmatpush3.bf16.msra.mxu0 %v59_v15 }
   0xe   :  { %1236 = vmatprep.subr.bf16.mxu0 %v60_v16 }
  0x11   :  { %1237 = vmatpush3.bf16.msra.mxu0 %v60_v16 }
  0x14   :  { %1239 = vmatmul.mubr.msk.bf16.vlgmr.msra.gmra.mrb[0].mxu0 %vm81_vm0, %v1583_v17 }
  0x15   :  { %1242 = vmatprep.mubr.msk.bf16.mxu0 %vm81_vm0, %v1588_v18 }
  0x1c   :  { %1243 = vmatmul.mubr.msk.bf16.gmra.mrb[4].mxu0 %vm81_vm0, %v1597_v19 }
  0x76   :  { %v1338_v22 = vpop.permute.xlu0 %1337 }
  0x77   :  { %v1348_v24 = vpop.permute.xlu1 %1347  ;;  %v1339_v27 = vunpack.i.l.bf16 %v1338_v22  ;;  %v1340_v30 = vunpack.i.h.bf16 %v1338_v22 }
  0x78   :  { %v1349_v41 = vunpack.i.l.bf16 %v1348_v24  ;;  %v1350_v43 = vunpack.i.h.bf16 %v1348_v24 }
  0x7a   :  { %v1343_v23 = vpop.permute.xlu0 %1342 }
  0x7b   :  { %v1345_v25 = vunpack.i.h.bf16 %v1343_v23  ;;  %v1344_v26 = vunpack.i.l.bf16 %v1343_v23  ;;  %v1353_v32 = vpop.permute.xlu1 %1352 }
  0x7c   :  { %v1354_v40 = vunpack.i.l.bf16 %v1353_v32  ;;  %v1355_v42 = vunpack.i.h.bf16 %v1353_v32 }
  0xe7   :  { %v1240_v28 = vpop.f32.mrb[0].mxu0 }
  0xe8   :  { %v128_v29 = vpop.f32.mrb[1].mxu0  ;;  %v194_v33 = vsel %vm191_vm1, %v1240_v28, %v1344_v26 }
  0xe9   :  { %v1241_v31 = vpop.f32.mrb[2].mxu0  ;;  %v192_v36 = vsel %vm191_vm1, %v128_v29, %v1339_v27 }
  0xea   :  { %v195_v34 = vsel %vm191_vm1, %v1241_v31, %v1345_v25  ;;  %v131_v35 = vpop.f32.mrb[3].mxu0 }
  0xeb   :  { %v201_v37 = vpack.c.bf16 %v195_v34, %v194_v33  ;;  %v193_v38 = vsel %vm191_vm1, %v131_v35, %v1340_v30 }
  0xec   :  { %v200_v39 = vpack.c.bf16 %v193_v38, %v192_v36 }
  0xee   :  { %1250 = vmatprep.mubr.msk.bf16.mxu1 %vm222_vm2, %v200_v39 }
  0xef   :  { %v1244_v44 = vpop.f32.mrb[4].mxu0  ;;  %1251 = vmatmul.mubr.msk.bf16.vlgmr.msra.gmra.mrb[0].mxu1 %vm222_vm2, %v201_v37 }
  0xf0   :  { %v198_v45 = vsel %vm191_vm1, %v1244_v44, %v1354_v40  ;;  %v144_v46 = vpop.f32.mrb[5].mxu0 }
  0xf1   :  { %v196_v47 = vsel %vm191_vm1, %v144_v46, %v1349_v41  ;;  %v1245_v48 = vpop.f32.mrb[6].mxu0 }
  0xf2   :  { %v199_v49 = vsel %vm191_vm1, %v1245_v48, %v1355_v42  ;;  %v147_v50 = vpop.f32.mrb[7].mxu0 }
  0xf3   :  { %v203_v51 = vpack.c.bf16 %v199_v49, %v198_v45  ;;  %v197_v52 = vsel %vm191_vm1, %v147_v50, %v1350_v43 }
  0xf4   :  { %v202_v53 = vpack.c.bf16 %v197_v52, %v196_v47 }
  0xf6   :  { %1254 = vmatprep.mubr.msk.bf16.mxu1 %vm222_vm2, %v202_v53 }
  0xf7   :  { %1255 = vmatmul.mubr.msk.bf16.gmra.mrb[4].mxu1 %vm222_vm2, %v203_v51 }
  0xf8   :  { %1266 = vmatprep.mubr.msk.bf16.mxu1 %vm81_vm0, %v1576_v12 }
 0x1c2   :  { %v1252_v55 = vpop.f32.mrb[0].mxu1 }
 0x1c3   :  { %v269_v56 = vpop.f32.mrb[1].mxu1  ;;  %v1624_v57 = vadd.f32 %v1252_v55, %v1138_v54 }
 0x1c4   :  { %v270_v58 = vadd.f32 %v1138_v54, %v269_v56  ;;  %v1253_v59 = vpop.f32.mrb[2].mxu1 }
 0x1c5   :  { %v272_v60 = vpop.f32.mrb[3].mxu1  ;;  %v1626_v63 = vadd.f32 %v1253_v59, %v1138_v54  ;;  %v302_v2 = vmul.f32 %v1624_v57, %v1624_v57 }
 0x1c6   :  { %v273_v61 = vadd.f32 %v1138_v54, %v272_v60  ;;  %v300_v62 = vmul.f32 %v270_v58, %v270_v58  ;;  %v1402_v60 = vld [vmem:[%s1865_s4] sm:$0xff]  }
 0x1c7   :  { %v303_v6 = vmul.f32 %v1626_v63, %v1626_v63  ;;  %v314_v10 = vsel %vm222_vm2, %v302_v2, 0.0  ;;  %1274 = vmatprep.subr.bf16.mxu0 %v1402_v60 }
 0x1c8   :  { %v308_v0 = vsel %vm222_vm2, %v300_v62, 0.0  ;;  %v301_v1 = vmul.f32 %v273_v61, %v273_v61  ;;  %1275 = vmatpush3.bf16.msra.mxu0 %v1402_v60 }
 0x1c9   :  { %309 = vadd.xlane.f32.xlu0 %v308_v0  ;;  %v317_v15 = vsel %vm222_vm2, %v303_v6, 0.0 }
 0x1ca   :  { %v1256_v3 = vpop.f32.mrb[4].mxu1  ;;  %v311_v4 = vsel %vm222_vm2, %v301_v1, 0.0 }
 0x1cb   :  { %312 = vadd.xlane.f32.xlu1 %v311_v4  ;;  %v285_v5 = vpop.f32.mrb[5].mxu1  ;;  %v1634_v7 = vadd.f32 %v1256_v3, %v1138_v54 }
 0x1cc   :  { %v1636_v8 = vadd.f32 %v1138_v54, %v285_v5  ;;  %v1257_v9 = vpop.f32.mrb[6].mxu1 }
 0x1cd   :  { %315 = vadd.xlane.f32.xlu0 %v314_v10  ;;  %v288_v11 = vpop.f32.mrb[7].mxu1  ;;  %v1644_v16 = vadd.f32 %v1257_v9, %v1138_v54  ;;  %v306_v22 = vmul.f32 %v1634_v7, %v1634_v7 }
 0x1ce   :  { %v1639_v13 = vadd.f32 %v1138_v54, %v288_v11  ;;  %v304_v14 = vmul.f32 %v1636_v8, %v1636_v8 }
 0x1cf   :  { %v326_v24 = vsel %vm222_vm2, %v306_v22, 0.0  ;;  %v307_v25 = vmul.f32 %v1644_v16, %v1644_v16 }
 0x1d0   :  { %v320_v20 = vsel %vm222_vm2, %v304_v14, 0.0  ;;  %v305_v21 = vmul.f32 %v1639_v13, %v1639_v13 }
 0x1d1   :  { %318 = vadd.xlane.f32.xlu0 %v317_v15  ;;  %321 = vadd.xlane.f32.xlu1 %v320_v20  ;;  %v329_v26 = vsel %vm222_vm2, %v307_v25, 0.0  ;;  %v1405_v15 = vld [vmem:[%s1865_s4 + $0x18] sm:$0xff]  }
 0x1d2   :  { %v323_v23 = vsel %vm222_vm2, %v305_v21, 0.0 }
 0x1d5   :  { %324 = vadd.xlane.f32.xlu0 %v323_v23  ;;  %327 = vadd.xlane.f32.xlu1 %v326_v24 }
 0x1d9   :  { %330 = vadd.xlane.f32.xlu0 %v329_v26 }
 0x256   :  { %v310_v27 = vpop.xlane.xlu0 %309 }
 0x257   :  { %v332_v28 = vmax.f32 %v310_v27, 1e-24 }
 0x258   :  { %v313_v29 = vpop.xlane.xlu1 %312 }
 0x259   :  { %1412 = vrsqrt.f32 %v332_v28  ;;  %v333_v30 = vmax.f32 %v313_v29, 1e-24 }
 0x25a   :  { %v316_v31 = vpop.xlane.xlu0 %315 }
 0x25b   :  { %1414 = vrsqrt.f32 %v333_v30  ;;  %v334_v32 = vmax.f32 %v316_v31, 1e-24 }
 0x25d   :  { %1416 = vrsqrt.f32 %v334_v32 }
 0x25e   :  { %v319_v33 = vpop.xlane.xlu0 %318  ;;  %v322_v34 = vpop.xlane.xlu1 %321 }
 0x25f   :  { %v335_v35 = vmax.f32 %v319_v33, 1e-24  ;;  %v336_v36 = vmax.f32 %v322_v34, 1e-24 }
 0x261   :  { %1418 = vrsqrt.f32 %v335_v35 }
 0x262   :  { %1420 = vrsqrt.f32 %v336_v36  ;;  %v325_v37 = vpop.xlane.xlu0 %324  ;;  %v328_v38 = vpop.xlane.xlu1 %327 }
 0x263   :  { %v1413_v39 = vpop.eup %1412  ;;  %v337_v40 = vmax.f32 %v325_v37, 1e-24  ;;  %v338_v41 = vmax.f32 %v328_v38, 1e-24 }
 0x264   :  { %v348_v42 = vmul.f32 %v1413_v39, %v270_v58 }
 0x265   :  { %v1415_v43 = vpop.eup %1414  ;;  %1422 = vrsqrt.f32 %v337_v40 }
 0x266   :  { %1424 = vrsqrt.f32 %v338_v41  ;;  %v331_v44 = vpop.xlane.xlu0 %330  ;;  %v349_v45 = vmul.f32 %v1415_v43, %v273_v61  ;;  %v356_v48 = vmax.f32 %v348_v42, 0.0  ;;  %v1403_v61 = vld [vmem:[%s1865_s4 + $0x8] sm:$0xff]  }
 0x267   :  { %v1417_v46 = vpop.eup %1416  ;;  %v339_v47 = vmax.f32 %v331_v44, 1e-24  ;;  %1276 = vmatprep.subr.bf16.mxu0 %v1403_v61 }
 0x268   :  { %v357_v49 = vmax.f32 %v349_v45, 0.0  ;;  %v350_v50 = vmul.f32 %v1417_v46, %v1624_v57  ;;  %1277 = vmatpush3.bf16.msra.mxu0 %v1403_v61 }
 0x269   :  { %1426 = vrsqrt.f32 %v339_v47 }
 0x26a   :  { %v373_v51 = vpack.c.bf16 %v357_v49, %v356_v48  ;;  %v1356_v52 = vpack.i.bf16 %v357_v49, %v356_v48  ;;  %v358_v56 = vmax.f32 %v350_v50, 0.0  ;;  %v1149_v50 = vld [vmem:[%s1866_s5] ss:$0 sm:$0xff] }
 0x26b   :  { %v1419_v53 = vpop.eup %1418 }
 0x26c   :  { %v1421_v54 = vpop.eup %1420  ;;  %1258 = vmatprep.subr.bf16.mxu1 %v373_v51  ;;  %1357 = vrot.lane.b32.xlu1 %v1356_v52, %s1493_s3  ;;  %v351_v55 = vmul.f32 %v1419_v53, %v1626_v63 }
 0x26d   :  { %1259 = vmatpush3.bf16.msra.mxu1 %v373_v51  ;;  %v352_v59 = vmul.f32 %v1421_v54, %v1636_v8 }
 0x26e   :  { %v359_v58 = vmax.f32 %v351_v55, 0.0 }
 0x26f   :  { %v1423_v57 = vpop.eup %1422  ;;  %v360_v63 = vmax.f32 %v352_v59, 0.0 }
 0x270   :  { %v1425_v62 = vpop.eup %1424  ;;  %v374_v0 = vpack.c.bf16 %v359_v58, %v358_v56  ;;  %v1361_v1 = vpack.i.bf16 %v359_v58, %v358_v56  ;;  %v353_v2 = vmul.f32 %v1423_v57, %v1639_v13 }
 0x271   :  { %v354_v4 = vmul.f32 %v1425_v62, %v1634_v7  ;;  %v1404_v7 = vld [vmem:[%s1865_s4 + $0x10] sm:$0xff]  }
 0x272   :  { %1260 = vmatprep.subr.bf16.mxu1 %v374_v0  ;;  %1362 = vrot.lane.b32.xlu0 %v1361_v1, %s1493_s3  ;;  %v361_v3 = vmax.f32 %v353_v2, 0.0 }
 0x273   :  { %v1427_v5 = vpop.eup %1426  ;;  %1261 = vmatpush3.bf16.msra.mxu1 %v374_v0  ;;  %v362_v10 = vmax.f32 %v354_v4, 0.0  ;;  %1278 = vmatprep.subr.bf16.mxu0 %v1404_v7 }
 0x274   :  { %v1366_v6 = vpack.i.bf16 %v361_v3, %v360_v63  ;;  %v375_v8 = vpack.c.bf16 %v361_v3, %v360_v63  ;;  %v355_v9 = vmul.f32 %v1427_v5, %v1644_v16  ;;  %1279 = vmatpush3.bf16.msra.mxu0 %v1404_v7 }
 0x275   :  { %1280 = vmatprep.subr.bf16.mxu0 %v1405_v15 }
 0x276   :  { %1367 = vrot.lane.b32.xlu1 %v1366_v6, %s1493_s3  ;;  %1262 = vmatprep.subr.bf16.mxu1 %v375_v8  ;;  %v363_v11 = vmax.f32 %v355_v9, 0.0 }
 0x277   :  { %1263 = vmatpush3.bf16.msra.mxu1 %v375_v8 }
 0x278   :  { %v1371_v13 = vpack.i.bf16 %v363_v11, %v362_v10  ;;  %v376_v14 = vpack.c.bf16 %v363_v11, %v362_v10  ;;  %1281 = vmatpush3.bf16.msra.mxu0 %v1405_v15 }
 0x27a   :  { %1372 = vrot.lane.b32.xlu1 %v1371_v13, %s1493_s3  ;;  %1264 = vmatprep.subr.bf16.mxu1 %v376_v14 }
 0x27b   :  { %1265 = vmatpush3.bf16.msra.mxu1 %v376_v14 }
 0x27e   :  { %1267 = vmatmul.mubr.msk.bf16.vlgmr.msra.gmra.mrb[8].mxu1 %vm81_vm0, %v1583_v17 }
 0x27f   :  { %1270 = vmatprep.mubr.msk.bf16.mxu1 %vm81_vm0, %v1588_v18 }
 0x286   :  { %1271 = vmatmul.mubr.msk.bf16.gmra.mrb[12].mxu1 %vm81_vm0, %v1597_v19 }
 0x287   :  { %1298 = vmatprep.mubr.msk.bf16.mxu1 %vm81_vm0, %v1576_v12 }
 0x2de   :  { %v1358_v16 = vpop.permute.xlu1 %1357 }
 0x2df   :  { %v1360_v12 = vunpack.i.h.bf16 %v1358_v16  ;;  %v1359_v26 = vunpack.i.l.bf16 %v1358_v16 }
 0x2e4   :  { %v1363_v20 = vpop.permute.xlu0 %1362 }
 0x2e5   :  { %v1365_v23 = vunpack.i.h.bf16 %v1363_v20  ;;  %v1364_v24 = vunpack.i.l.bf16 %v1363_v20 }
 0x2e8   :  { %v1368_v21 = vpop.permute.xlu1 %1367 }
 0x2e9   :  { %v1370_v40 = vunpack.i.h.bf16 %v1368_v21  ;;  %v1369_v41 = vunpack.i.l.bf16 %v1368_v21 }
 0x2ec   :  { %v1373_v35 = vpop.permute.xlu1 %1372 }
 0x2ed   :  { %v1375_v37 = vunpack.i.h.bf16 %v1373_v35  ;;  %v1374_v38 = vunpack.i.l.bf16 %v1373_v35 }
 0x351   :  { %v1268_v22 = vpop.f32.mrb[8].mxu1 }
 0x352   :  { %v411_v25 = vpop.f32.mrb[9].mxu1  ;;  %v476_v28 = vsel %vm222_vm2, %v1268_v22, %v1364_v24 }
 0x353   :  { %v1269_v27 = vpop.f32.mrb[10].mxu1  ;;  %v474_v31 = vsel %vm222_vm2, %v411_v25, %v1359_v26 }
 0x354   :  { %v477_v29 = vsel %vm222_vm2, %v1269_v27, %v1365_v23  ;;  %v414_v30 = vpop.f32.mrb[11].mxu1 }
 0x355   :  { %v483_v32 = vpack.c.bf16 %v477_v29, %v476_v28  ;;  %v475_v33 = vsel %vm222_vm2, %v414_v30, %v1360_v12 }
 0x356   :  { %v482_v34 = vpack.c.bf16 %v475_v33, %v474_v31 }
 0x358   :  { %1282 = vmatprep.mubr.msk.bf16.mxu0 %vm81_vm0, %v482_v34 }
 0x359   :  { %v1272_v36 = vpop.f32.mrb[12].mxu1  ;;  %1283 = vmatmul.mubr.msk.bf16.vlgmr.msra.gmra.mrb[8].mxu0 %vm81_vm0, %v483_v32 }
 0x35a   :  { %v427_v39 = vpop.f32.mrb[13].mxu1  ;;  %v480_v43 = vsel %vm222_vm2, %v1272_v36, %v1374_v38 }
 0x35b   :  { %v1273_v42 = vpop.f32.mrb[14].mxu1  ;;  %v478_v46 = vsel %vm222_vm2, %v427_v39, %v1369_v41 }
 0x35c   :  { %v481_v44 = vsel %vm222_vm2, %v1273_v42, %v1375_v37  ;;  %v430_v45 = vpop.f32.mrb[15].mxu1 }
 0x35d   :  { %v485_v47 = vpack.c.bf16 %v481_v44, %v480_v43  ;;  %v479_v48 = vsel %vm222_vm2, %v430_v45, %v1370_v40 }
 0x35e   :  { %v484_v49 = vpack.c.bf16 %v479_v48, %v478_v46 }
 0x360   :  { %1286 = vmatprep.mubr.msk.bf16.mxu0 %vm81_vm0, %v484_v49 }
 0x361   :  { %1287 = vmatmul.mubr.msk.bf16.gmra.mrb[12].mxu0 %vm81_vm0, %v485_v47 }
 0x42c   :  { %v1284_v51 = vpop.f32.mrb[8].mxu0 }
 0x42d   :  { %v562_v52 = vpop.f32.mrb[9].mxu0  ;;  %v1701_v53 = vadd.f32 %v1284_v51, %v1149_v50 }
 0x42e   :  { %v563_v54 = vadd.f32 %v1149_v50, %v562_v52  ;;  %v1285_v55 = vpop.f32.mrb[10].mxu0 }
 0x42f   :  { %v565_v56 = vpop.f32.mrb[11].mxu0  ;;  %v1703_v60 = vadd.f32 %v1285_v55, %v1149_v50  ;;  %v595_v62 = vmul.f32 %v1701_v53, %v1701_v53 }
 0x430   :  { %v566_v58 = vadd.f32 %v1149_v50, %v565_v56  ;;  %v593_v59 = vmul.f32 %v563_v54, %v563_v54  ;;  %v1406_v56 = vld [vmem:[%s1867_s6] sm:$0xff]  }
 0x431   :  { %v596_v63 = vmul.f32 %v1703_v60, %v1703_v60  ;;  %v607_v6 = vsel %vm222_vm2, %v595_v62, 0.0  ;;  %1306 = vmatprep.subr.bf16.mxu0 %v1406_v56 }
 0x432   :  { %v601_v57 = vsel %vm222_vm2, %v593_v59, 0.0  ;;  %v594_v61 = vmul.f32 %v566_v58, %v566_v58  ;;  %1307 = vmatpush3.bf16.msra.mxu0 %v1406_v56 }
 0x433   :  { %602 = vadd.xlane.f32.xlu0 %v601_v57  ;;  %v610_v11 = vsel %vm222_vm2, %v596_v63, 0.0 }
 0x434   :  { %v1288_v0 = vpop.f32.mrb[12].mxu0  ;;  %v604_v1 = vsel %vm222_vm2, %v594_v61, 0.0 }
 0x435   :  { %v578_v2 = vpop.f32.mrb[13].mxu0  ;;  %605 = vadd.xlane.f32.xlu1 %v604_v1  ;;  %v1711_v3 = vadd.f32 %v1288_v0, %v1149_v50 }
 0x436   :  { %v1713_v4 = vadd.f32 %v1149_v50, %v578_v2  ;;  %v1289_v5 = vpop.f32.mrb[14].mxu0 }
 0x437   :  { %v581_v8 = vpop.f32.mrb[15].mxu0  ;;  %608 = vadd.xlane.f32.xlu0 %v607_v6  ;;  %v1721_v13 = vadd.f32 %v1289_v5, %v1149_v50  ;;  %v599_v7 = vmul.f32 %v1711_v3, %v1711_v3 }
 0x438   :  { %v1716_v9 = vadd.f32 %v1149_v50, %v581_v8  ;;  %v597_v10 = vmul.f32 %v1713_v4, %v1713_v4 }
 0x439   :  { %v619_v16 = vsel %vm222_vm2, %v599_v7, 0.0  ;;  %v600_v21 = vmul.f32 %v1721_v13, %v1721_v13 }
 0x43a   :  { %v613_v14 = vsel %vm222_vm2, %v597_v10, 0.0  ;;  %v598_v15 = vmul.f32 %v1716_v9, %v1716_v9  ;;  %v1409_v10 = vld [vmem:[%s1867_s6 + $0x18] sm:$0xff]  }
 0x43b   :  { %614 = vadd.xlane.f32.xlu1 %v613_v14  ;;  %611 = vadd.xlane.f32.xlu0 %v610_v11  ;;  %v622_v22 = vsel %vm222_vm2, %v600_v21, 0.0 }
 0x43c   :  { %v616_v20 = vsel %vm222_vm2, %v598_v15, 0.0 }
 0x43f   :  { %620 = vadd.xlane.f32.xlu1 %v619_v16  ;;  %617 = vadd.xlane.f32.xlu0 %v616_v20 }
 0x443   :  { %623 = vadd.xlane.f32.xlu0 %v622_v22 }
 0x4c0   :  { %v603_v23 = vpop.xlane.xlu0 %602 }
 0x4c1   :  { %v625_v24 = vmax.f32 %v603_v23, 1e-24 }
 0x4c2   :  { %v606_v25 = vpop.xlane.xlu1 %605 }
 0x4c3   :  { %1428 = vrsqrt.f32 %v625_v24  ;;  %v626_v12 = vmax.f32 %v606_v25, 1e-24 }
 0x4c4   :  { %v609_v26 = vpop.xlane.xlu0 %608 }
 0x4c5   :  { %1430 = vrsqrt.f32 %v626_v12  ;;  %v627_v27 = vmax.f32 %v609_v26, 1e-24 }
 0x4c7   :  { %1432 = vrsqrt.f32 %v627_v27 }
 0x4c8   :  { %v615_v28 = vpop.xlane.xlu1 %614  ;;  %v612_v29 = vpop.xlane.xlu0 %611 }
 0x4c9   :  { %v629_v30 = vmax.f32 %v615_v28, 1e-24  ;;  %v628_v31 = vmax.f32 %v612_v29, 1e-24 }
 0x4cb   :  { %1434 = vrsqrt.f32 %v629_v30 }
 0x4cc   :  { %1436 = vrsqrt.f32 %v628_v31  ;;  %v621_v32 = vpop.xlane.xlu1 %620  ;;  %v618_v33 = vpop.xlane.xlu0 %617 }
 0x4cd   :  { %v1429_v34 = vpop.eup %1428  ;;  %v631_v35 = vmax.f32 %v621_v32, 1e-24  ;;  %v630_v36 = vmax.f32 %v618_v33, 1e-24 }
 0x4ce   :  { %v641_v37 = vmul.f32 %v1429_v34, %v563_v54 }
 0x4cf   :  { %v1431_v38 = vpop.eup %1430  ;;  %1438 = vrsqrt.f32 %v631_v35 }
 0x4d0   :  { %1440 = vrsqrt.f32 %v630_v36  ;;  %v624_v39 = vpop.xlane.xlu0 %623  ;;  %v642_v40 = vmul.f32 %v1431_v38, %v566_v58  ;;  %v649_v43 = vmax.f32 %v641_v37, 0.0 }
 0x4d1   :  { %v1433_v41 = vpop.eup %1432  ;;  %v632_v42 = vmax.f32 %v624_v39, 1e-24 }
 0x4d2   :  { %v650_v44 = vmax.f32 %v642_v40, 0.0  ;;  %v643_v47 = vmul.f32 %v1433_v41, %v1701_v53  ;;  %v1407_v53 = vld [vmem:[%s1867_s6 + $0x8] sm:$0xff]  }
 0x4d3   :  { %1442 = vrsqrt.f32 %v632_v42  ;;  %1308 = vmatprep.subr.bf16.mxu0 %v1407_v53  ;;  %v1162_v42 = vld [vmem:[%s1868_s7] ss:$0 sm:$0xff] }
 0x4d4   :  { %v1376_v45 = vpack.i.bf16 %v650_v44, %v649_v43  ;;  %v666_v46 = vpack.c.bf16 %v650_v44, %v649_v43  ;;  %v651_v51 = vmax.f32 %v643_v47, 0.0  ;;  %1309 = vmatpush3.bf16.msra.mxu0 %v1407_v53 }
 0x4d5   :  { %v1435_v48 = vpop.eup %1434 }
 0x4d6   :  { %v1437_v49 = vpop.eup %1436  ;;  %1377 = vrot.lane.b32.xlu1 %v1376_v45, %s1493_s3  ;;  %1290 = vmatprep.subr.bf16.mxu1 %v666_v46  ;;  %v645_v55 = vmul.f32 %v1435_v48, %v1713_v4 }
 0x4d7   :  { %1291 = vmatpush3.bf16.msra.mxu1 %v666_v46  ;;  %v644_v50 = vmul.f32 %v1437_v49, %v1703_v60 }
 0x4d8   :  { %v653_v0 = vmax.f32 %v645_v55, 0.0 }
 0x4d9   :  { %v1439_v52 = vpop.eup %1438  ;;  %v652_v54 = vmax.f32 %v644_v50, 0.0 }
 0x4da   :  { %v1441_v58 = vpop.eup %1440  ;;  %v647_v60 = vmul.f32 %v1439_v52, %v1711_v3 }
 0x4db   :  { %v1381_v59 = vpack.i.bf16 %v652_v54, %v651_v51  ;;  %v667_v57 = vpack.c.bf16 %v652_v54, %v651_v51  ;;  %v646_v61 = vmul.f32 %v1441_v58, %v1716_v9  ;;  %v1408_v9 = vld [vmem:[%s1867_s6 + $0x10] sm:$0xff]  }
 0x4dc   :  { %v655_v5 = vmax.f32 %v647_v60, 0.0  ;;  %1310 = vmatprep.subr.bf16.mxu0 %v1408_v9 }
 0x4dd   :  { %v1443_v62 = vpop.eup %1442  ;;  %1382 = vrot.lane.b32.xlu0 %v1381_v59, %s1493_s3  ;;  %1292 = vmatprep.subr.bf16.mxu1 %v667_v57  ;;  %v654_v1 = vmax.f32 %v646_v61, 0.0 }
 0x4de   :  { %1293 = vmatpush3.bf16.msra.mxu1 %v667_v57  ;;  %v648_v2 = vmul.f32 %v1443_v62, %v1721_v13  ;;  %1311 = vmatpush3.bf16.msra.mxu0 %v1408_v9 }
 0x4df   :  { %v1386_v63 = vpack.i.bf16 %v654_v1, %v653_v0  ;;  %v668_v4 = vpack.c.bf16 %v654_v1, %v653_v0  ;;  %1312 = vmatprep.subr.bf16.mxu0 %v1409_v10 }
 0x4e0   :  { %v656_v6 = vmax.f32 %v648_v2, 0.0 }
 0x4e1   :  { %1387 = vrot.lane.b32.xlu1 %v1386_v63, %s1493_s3  ;;  %1294 = vmatprep.subr.bf16.mxu1 %v668_v4 }
 0x4e2   :  { %1295 = vmatpush3.bf16.msra.mxu1 %v668_v4  ;;  %v1391_v3 = vpack.i.bf16 %v656_v6, %v655_v5  ;;  %v669_v8 = vpack.c.bf16 %v656_v6, %v655_v5  ;;  %1313 = vmatpush3.bf16.msra.mxu0 %v1409_v10 }
 0x4e4   :  { %1296 = vmatprep.subr.bf16.mxu1 %v669_v8 }
 0x4e5   :  { %1392 = vrot.lane.b32.xlu1 %v1391_v3, %s1493_s3 }
 0x4e6   :  { %1297 = vmatpush3.bf16.msra.mxu1 %v669_v8 }
 0x4e9   :  { %1299 = vmatmul.mubr.msk.bf16.vlgmr.msra.gmra.mrb[16].mxu1 %vm81_vm0, %v1583_v17 }
 0x4ea   :  { %1302 = vmatprep.mubr.msk.bf16.mxu1 %vm81_vm0, %v1588_v18 }
 0x4f1   :  { %1303 = vmatmul.mubr.msk.bf16.gmra.mrb[20].mxu1 %vm81_vm0, %v1597_v19 }
 0x548   :  { %v1378_v11 = vpop.permute.xlu1 %1377 }
 0x549   :  { %v1380_v19 = vunpack.i.h.bf16 %v1378_v11  ;;  %v1379_v16 = vunpack.i.l.bf16 %v1378_v11 }
 0x54f   :  { %v1383_v17 = vpop.permute.xlu0 %1382 }
 0x550   :  { %v1385_v18 = vunpack.i.h.bf16 %v1383_v17  ;;  %v1384_v7 = vunpack.i.l.bf16 %v1383_v17  ;;  %v1410_v17 = vld [vmem:[%s1869_s8] sm:$0xff]  }
 0x551   :  { %1322 = vmatprep.subr.bf16.mxu1 %v1410_v17 }
 0x552   :  { %1323 = vmatpush3.bf16.msra.mxu1 %v1410_v17 }
 0x553   :  { %v1388_v13 = vpop.permute.xlu1 %1387 }
 0x554   :  { %v1390_v32 = vunpack.i.h.bf16 %v1388_v13  ;;  %v1389_v33 = vunpack.i.l.bf16 %v1388_v13  ;;  %v1411_v13 = vld [vmem:[%s1869_s8 + $0x8] sm:$0xff]  }
 0x555   :  { %1324 = vmatprep.subr.bf16.mxu1 %v1411_v13 }
 0x556   :  { %1325 = vmatpush3.bf16.msra.mxu1 %v1411_v13 }
 0x557   :  { %v1393_v27 = vpop.permute.xlu1 %1392 }
 0x558   :  { %v1395_v29 = vunpack.i.h.bf16 %v1393_v27  ;;  %v1394_v30 = vunpack.i.l.bf16 %v1393_v27 }
 0x5bc   :  { %v1300_v14 = vpop.f32.mrb[16].mxu1 }
 0x5bd   :  { %v704_v15 = vpop.f32.mrb[17].mxu1  ;;  %v769_v21 = vsel %vm222_vm2, %v1300_v14, %v1384_v7 }
 0x5be   :  { %v1301_v20 = vpop.f32.mrb[18].mxu1  ;;  %v767_v24 = vsel %vm222_vm2, %v704_v15, %v1379_v16 }
 0x5bf   :  { %v770_v22 = vsel %vm222_vm2, %v1301_v20, %v1385_v18  ;;  %v707_v23 = vpop.f32.mrb[19].mxu1 }
 0x5c0   :  { %v776_v25 = vpack.c.bf16 %v770_v22, %v769_v21  ;;  %v768_v12 = vsel %vm222_vm2, %v707_v23, %v1380_v19 }
 0x5c1   :  { %v775_v26 = vpack.c.bf16 %v768_v12, %v767_v24 }
 0x5c3   :  { %1314 = vmatprep.mubr.msk.bf16.mxu0 %vm81_vm0, %v775_v26 }
 0x5c4   :  { %v1304_v28 = vpop.f32.mrb[20].mxu1  ;;  %1315 = vmatmul.mubr.msk.bf16.vlgmr.msra.gmra.mrb[16].mxu0 %vm81_vm0, %v776_v25 }
 0x5c5   :  { %v720_v31 = vpop.f32.mrb[21].mxu1  ;;  %v773_v35 = vsel %vm222_vm2, %v1304_v28, %v1394_v30 }
 0x5c6   :  { %v1305_v34 = vpop.f32.mrb[22].mxu1  ;;  %v771_v38 = vsel %vm222_vm2, %v720_v31, %v1389_v33 }
 0x5c7   :  { %v774_v36 = vsel %vm222_vm2, %v1305_v34, %v1395_v29  ;;  %v723_v37 = vpop.f32.mrb[23].mxu1 }
 0x5c8   :  { %v778_v39 = vpack.c.bf16 %v774_v36, %v773_v35  ;;  %v772_v40 = vsel %vm222_vm2, %v723_v37, %v1390_v32 }
 0x5c9   :  { %v777_v41 = vpack.c.bf16 %v772_v40, %v771_v38 }
 0x5cb   :  { %1318 = vmatprep.mubr.msk.bf16.mxu0 %vm81_vm0, %v777_v41 }
 0x5cc   :  { %1319 = vmatmul.mubr.msk.bf16.gmra.mrb[20].mxu0 %vm81_vm0, %v778_v39 }
 0x697   :  { %v1316_v43 = vpop.f32.mrb[16].mxu0 }
 0x698   :  { %v855_v44 = vpop.f32.mrb[17].mxu0  ;;  %v1776_v45 = vadd.f32 %v1316_v43, %v1162_v42 }
 0x699   :  { %v1778_v46 = vadd.f32 %v1162_v42, %v855_v44  ;;  %v1317_v47 = vpop.f32.mrb[18].mxu0 }
 0x69a   :  { %v858_v48 = vpop.f32.mrb[19].mxu0  ;;  %v1784_v51 = vadd.f32 %v1317_v47, %v1162_v42  ;;  %v888_v55 = vmul.f32 %v1776_v45, %v1776_v45 }
 0x69b   :  { %v1780_v49 = vadd.f32 %v1162_v42, %v858_v48  ;;  %v886_v50 = vmul.f32 %v1778_v46, %v1778_v46 }
 0x69c   :  { %v889_v59 = vmul.f32 %v1784_v51, %v1784_v51  ;;  %v900_v62 = vsel %vm222_vm2, %v888_v55, 0.0 }
 0x69d   :  { %v894_v52 = vsel %vm222_vm2, %v886_v50, 0.0  ;;  %v887_v54 = vmul.f32 %v1780_v49, %v1780_v49 }
 0x69e   :  { %895 = vadd.xlane.f32.xlu0 %v894_v52  ;;  %v903_v63 = vsel %vm222_vm2, %v889_v59, 0.0 }
 0x69f   :  { %v1320_v56 = vpop.f32.mrb[20].mxu0  ;;  %v897_v58 = vsel %vm222_vm2, %v887_v54, 0.0 }
 0x6a0   :  { %v871_v53 = vpop.f32.mrb[21].mxu0  ;;  %898 = vadd.xlane.f32.xlu1 %v897_v58  ;;  %v1794_v57 = vadd.f32 %v1320_v56, %v1162_v42 }
 0x6a1   :  { %v1796_v61 = vadd.f32 %v1162_v42, %v871_v53  ;;  %v1321_v60 = vpop.f32.mrb[22].mxu0 }
 0x6a2   :  { %v874_v0 = vpop.f32.mrb[23].mxu0  ;;  %901 = vadd.xlane.f32.xlu0 %v900_v62  ;;  %v1804_v4 = vadd.f32 %v1321_v60, %v1162_v42  ;;  %v892_v6 = vmul.f32 %v1794_v57, %v1794_v57 }
 0x6a3   :  { %v1799_v1 = vadd.f32 %v1162_v42, %v874_v0  ;;  %v890_v2 = vmul.f32 %v1796_v61, %v1796_v61 }
 0x6a4   :  { %v912_v8 = vsel %vm222_vm2, %v892_v6, 0.0  ;;  %v893_v10 = vmul.f32 %v1804_v4, %v1804_v4 }
 0x6a5   :  { %v906_v5 = vsel %vm222_vm2, %v890_v2, 0.0  ;;  %v891_v3 = vmul.f32 %v1799_v1, %v1799_v1 }
 0x6a6   :  { %907 = vadd.xlane.f32.xlu1 %v906_v5  ;;  %904 = vadd.xlane.f32.xlu0 %v903_v63  ;;  %v915_v11 = vsel %vm222_vm2, %v893_v10, 0.0 }
 0x6a7   :  { %v909_v9 = vsel %vm222_vm2, %v891_v3, 0.0 }
 0x6aa   :  { %913 = vadd.xlane.f32.xlu1 %v912_v8  ;;  %910 = vadd.xlane.f32.xlu0 %v909_v9 }
 0x6ae   :  { %916 = vadd.xlane.f32.xlu0 %v915_v11 }
 0x72b   :  { %v896_v14 = vpop.xlane.xlu0 %895 }
 0x72c   :  { %v918_v18 = vmax.f32 %v896_v14, 1e-24 }
 0x72d   :  { %v899_v7 = vpop.xlane.xlu1 %898 }
 0x72e   :  { %1444 = vrsqrt.f32 %v918_v18  ;;  %v919_v15 = vmax.f32 %v899_v7, 1e-24 }
 0x72f   :  { %v902_v19 = vpop.xlane.xlu0 %901 }
 0x730   :  { %1446 = vrsqrt.f32 %v919_v15  ;;  %v920_v16 = vmax.f32 %v902_v19, 1e-24 }
 0x732   :  { %1448 = vrsqrt.f32 %v920_v16 }
 0x733   :  { %v908_v20 = vpop.xlane.xlu1 %907  ;;  %v905_v21 = vpop.xlane.xlu0 %904 }
 0x734   :  { %v921_v22 = vmax.f32 %v905_v21, 1e-24  ;;  %v922_v23 = vmax.f32 %v908_v20, 1e-24 }
 0x736   :  { %1450 = vrsqrt.f32 %v921_v22 }
 0x737   :  { %v914_v24 = vpop.xlane.xlu1 %913  ;;  %v911_v25 = vpop.xlane.xlu0 %910  ;;  %1452 = vrsqrt.f32 %v922_v23 }
 0x738   :  { %v1445_v12 = vpop.eup %1444  ;;  %v924_v26 = vmax.f32 %v914_v24, 1e-24  ;;  %v923_v27 = vmax.f32 %v911_v25, 1e-24 }
 0x739   :  { %v934_v30 = vmul.f32 %v1445_v12, %v1778_v46 }
 0x73a   :  { %v1447_v28 = vpop.eup %1446  ;;  %1454 = vrsqrt.f32 %v923_v27 }
 0x73b   :  { %v917_v29 = vpop.xlane.xlu0 %916  ;;  %v935_v31 = vmul.f32 %v1447_v28, %v1780_v49  ;;  %1456 = vrsqrt.f32 %v924_v26  ;;  %v1171_v49 = vld [vmem:[%s1870_s9] ss:$0 sm:$0xff] }
 0x73c   :  { %v925_v32 = vmax.f32 %v917_v29, 1e-24  ;;  %v1449_v34 = vpop.eup %1448 }
 0x73d   :  { %v942_v33 = vpack.c.bf16 %v935_v31, %v934_v30  ;;  %v936_v36 = vmul.f32 %v1449_v34, %v1776_v45 }
 0x73e   :  { %1458 = vrsqrt.f32 %v925_v32 }
 0x73f   :  { %1326 = vmatprep.mubr.msk.bf16.mxu1 %vm222_vm2, %v942_v33 }
 0x740   :  { %v1451_v35 = vpop.eup %1450 }
 0x741   :  { %v937_v37 = vmul.f32 %v1451_v35, %v1784_v51  ;;  %v1453_v38 = vpop.eup %1452 }
 0x742   :  { %v938_v42 = vmul.f32 %v1453_v38, %v1796_v61 }
 0x743   :  { %v943_v39 = vpack.c.bf16 %v937_v37, %v936_v36 }
 0x744   :  { %v1455_v40 = vpop.eup %1454 }
 0x745   :  { %v1457_v41 = vpop.eup %1456  ;;  %1327 = vmatmul.mubr.msk.bf16.vlgmr.msra.gmra.mrb[24].mxu1 %vm222_vm2, %v943_v39  ;;  %v939_v43 = vmul.f32 %v1455_v40, %v1799_v1 }
 0x746   :  { %v940_v47 = vmul.f32 %v1457_v41, %v1794_v57 }
 0x747   :  { %v944_v46 = vpack.c.bf16 %v939_v43, %v938_v42 }
 0x748   :  { %v1459_v44 = vpop.eup %1458 }
 0x749   :  { %v941_v48 = vmul.f32 %v1459_v44, %v1804_v4  ;;  %1330 = vmatprep.mubr.msk.bf16.mxu1 %vm222_vm2, %v944_v46 }
 0x74b   :  { %v945_v45 = vpack.c.bf16 %v941_v48, %v940_v47 }
 0x74d   :  { %1331 = vmatmul.mubr.msk.bf16.gmra.mrb[28].mxu1 %vm222_vm2, %v945_v45 }
 0x818   :  { %v1328_v50 = vpop.f32.mrb[24].mxu1 }
 0x819   :  { %v1024_v51 = vadd.f32 %v1328_v50, %v1171_v49  ;;  %v1015_v52 = vpop.f32.mrb[25].mxu1 }
 0x81a   :  { %v1329_v54 = vpop.f32.mrb[26].mxu1  ;;  %v1016_v58 = vadd.f32 %v1171_v49, %v1015_v52 }
 0x81b   :  { %v1027_v55 = vadd.f32 %v1329_v54, %v1171_v49  ;;  %1050 = vmax.xlane.f32.xlu1 %v1024_v51  ;;  %v1018_v56 = vpop.f32.mrb[27].mxu1 }
 0x81c   :  { %v1019_v53 = vadd.f32 %v1171_v49, %v1018_v56 }
 0x81d   :  { %1052 = vmax.xlane.f32.xlu0 %v1027_v55 }
 0x81f   :  { %1046 = vmax.xlane.f32.xlu1 %v1016_v58 }
 0x820   :  { %v1332_v59 = vpop.f32.mrb[28].mxu1 }
 0x821   :  { %1048 = vmax.xlane.f32.xlu0 %v1019_v53  ;;  %v1031_v57 = vpop.f32.mrb[29].mxu1  ;;  %v1040_v1 = vadd.f32 %v1332_v59, %v1171_v49 }
 0x822   :  { %v1032_v61 = vadd.f32 %v1171_v49, %v1031_v57  ;;  %v1333_v60 = vpop.f32.mrb[30].mxu1 }
 0x823   :  { %v1034_v62 = vpop.f32.mrb[31].mxu1  ;;  %v1043_v2 = vadd.f32 %v1333_v60, %v1171_v49 }
 0x824   :  { %v1035_v0 = vadd.f32 %v1171_v49, %v1034_v62  ;;  %1054 = vmax.xlane.f32.xlu1 %v1032_v61 }
 0x826   :  { %1056 = vmax.xlane.f32.xlu0 %v1035_v0 }
 0x828   :  { %1058 = vmax.xlane.f32.xlu1 %v1040_v1 }
 0x82a   :  { %1060 = vmax.xlane.f32.xlu0 %v1043_v2 }
 0x8a8   :  { %v1051_v63 = vpop.xlane.xlu1 %1050 }
 0x8a9   :  { %v1064_v4 = vsub.f32 %v1024_v51, %v1051_v63 }
 0x8aa   :  { %v1053_v5 = vpop.xlane.xlu0 %1052 }
 0x8ab   :  { %v1074_v6 = vmul.f32 1.442695, %v1064_v4  ;;  %v1065_v3 = vsub.f32 %v1027_v55, %v1053_v5 }
 0x8ac   :  { %v1047_v8 = vpop.xlane.xlu1 %1046 }
 0x8ad   :  { %1460 = vpow2.f32 %v1074_v6  ;;  %v1076_v9 = vmul.f32 1.442695, %v1065_v3  ;;  %v1062_v10 = vsub.f32 %v1016_v58, %v1047_v8 }
 0x8ae   :  { %v1049_v11 = vpop.xlane.xlu0 %1048 }
 0x8af   :  { %1462 = vpow2.f32 %v1076_v9  ;;  %v1070_v17 = vmul.f32 1.442695, %v1062_v10  ;;  %v1063_v13 = vsub.f32 %v1019_v53, %v1049_v11 }
 0x8b1   :  { %1464 = vpow2.f32 %v1070_v17  ;;  %v1072_v14 = vmul.f32 1.442695, %v1063_v13  ;;  %v1055_v18 = vpop.xlane.xlu1 %1054 }
 0x8b2   :  { %v1066_v7 = vsub.f32 %v1032_v61, %v1055_v18 }
 0x8b3   :  { %1466 = vpow2.f32 %v1072_v14  ;;  %v1057_v15 = vpop.xlane.xlu0 %1056 }
 0x8b4   :  { %v1078_v19 = vmul.f32 1.442695, %v1066_v7  ;;  %v1067_v16 = vsub.f32 %v1035_v0, %v1057_v15 }
 0x8b5   :  { %v1059_v20 = vpop.xlane.xlu1 %1058 }
 0x8b6   :  { %1468 = vpow2.f32 %v1078_v19  ;;  %v1080_v21 = vmul.f32 1.442695, %v1067_v16  ;;  %v1068_v22 = vsub.f32 %v1040_v1, %v1059_v20 }
 0x8b7   :  { %v1461_v23 = vpop.eup %1460  ;;  %v1061_v24 = vpop.xlane.xlu0 %1060 }
 0x8b8   :  { %1470 = vpow2.f32 %v1080_v21  ;;  %v1082_v25 = vmul.f32 1.442695, %v1068_v22  ;;  %v1069_v12 = vsub.f32 %v1043_v2, %v1061_v24  ;;  %1090 = vadd.xlane.f32.xlu1 %v1461_v23 }
 0x8b9   :  { %v1463_v26 = vpop.eup %1462 }
 0x8ba   :  { %1472 = vpow2.f32 %v1082_v25  ;;  %v1084_v27 = vmul.f32 1.442695, %v1069_v12  ;;  %1092 = vadd.xlane.f32.xlu0 %v1463_v26 }
 0x8bb   :  { %v1465_v28 = vpop.eup %1464 }
 0x8bc   :  { %1474 = vpow2.f32 %v1084_v27  ;;  %1086 = vadd.xlane.f32.xlu1 %v1465_v28 }
 0x8bd   :  { %v1467_v29 = vpop.eup %1466 }
 0x8be   :  { %1088 = vadd.xlane.f32.xlu0 %v1467_v29 }
 0x8c0   :  { %v1469_v30 = vpop.eup %1468 }
 0x8c1   :  { %1094 = vadd.xlane.f32.xlu1 %v1469_v30 }
 0x8c2   :  { %v1471_v31 = vpop.eup %1470 }
 0x8c3   :  { %1096 = vadd.xlane.f32.xlu0 %v1471_v31 }
 0x8c4   :  { %v1473_v32 = vpop.eup %1472 }
 0x8c5   :  { %1098 = vadd.xlane.f32.xlu1 %v1473_v32 }
 0x8c6   :  { %v1475_v33 = vpop.eup %1474 }
 0x8c7   :  { %1100 = vadd.xlane.f32.xlu0 %v1475_v33 }
 0x945   :  { %v1091_v34 = vpop.xlane.xlu1 %1090 }
 0x946   :  { %1476 = vrcp.f32 %v1091_v34 }
 0x947   :  { %v1093_v35 = vpop.xlane.xlu0 %1092 }
 0x948   :  { %1478 = vrcp.f32 %v1093_v35 }
 0x949   :  { %v1087_v36 = vpop.xlane.xlu1 %1086 }
 0x94a   :  { %1480 = vrcp.f32 %v1087_v36 }
 0x94b   :  { %v1089_v37 = vpop.xlane.xlu0 %1088 }
 0x94c   :  { %1482 = vrcp.f32 %v1089_v37 }
 0x94e   :  { %v1095_v38 = vpop.xlane.xlu1 %1094 }
 0x94f   :  { %1484 = vrcp.f32 %v1095_v38 }
 0x950   :  { %v1477_v39 = vpop.eup %1476  ;;  %v1097_v40 = vpop.xlane.xlu0 %1096 }
 0x951   :  { %v1112_v41 = vmul.f32 %v1477_v39, %v1461_v23  ;;  %1486 = vrcp.f32 %v1097_v40 }
 0x952   :  { %v1479_v42 = vpop.eup %1478  ;;  %v1099_v43 = vpop.xlane.xlu1 %1098 }
 0x953   :  { %1120 = vst [vmem:[%s1871_s10 + $0x10] sm:$0xff] %v1112_v41  ;;  %v1113_v44 = vmul.f32 %v1479_v42, %v1463_v26  ;;  %1488 = vrcp.f32 %v1099_v43 }
 0x954   :  { %v1481_v46 = vpop.eup %1480  ;;  %v1101_v47 = vpop.xlane.xlu0 %1100 }
 0x955   :  { %1121 = vst [vmem:[%s1871_s10 + $0x18] sm:$0xff] %v1113_v44  ;;  %v1110_v48 = vmul.f32 %v1481_v46, %v1465_v28  ;;  %1490 = vrcp.f32 %v1101_v47 }
 0x956   :  { %v1483_v45 = vpop.eup %1482 }
 0x957   :  { %1118 = vst [vmem:[%s1871_s10] sm:$0xff] %v1110_v48  ;;  %v1111_v49 = vmul.f32 %v1483_v45, %v1467_v29 }
 0x959   :  { %v1485_v50 = vpop.eup %1484  ;;  %1119 = vst [vmem:[%s1871_s10 + $0x8] sm:$0xff] %v1111_v49 }
 0x95a   :  { %v1114_v51 = vmul.f32 %v1485_v50, %v1469_v30 }
 0x95b   :  { %v1487_v52 = vpop.eup %1486 }
 0x95c   :  { %1122 = vst [vmem:[%s1871_s10 + $0x20] sm:$0xff] %v1114_v51  ;;  %v1115_v54 = vmul.f32 %v1487_v52, %v1471_v31 }
 0x95d   :  { %v1489_v55 = vpop.eup %1488 }
 0x95e   :  { %1123 = vst [vmem:[%s1871_s10 + $0x28] sm:$0xff] %v1115_v54  ;;  %v1116_v56 = vmul.f32 %v1489_v55, %v1473_v32 }
 0x95f   :  { %v1491_v58 = vpop.eup %1490 }
 0x960   :  { %1124 = vst [vmem:[%s1871_s10 + $0x30] sm:$0xff] %v1116_v56  ;;  %v1117_v53 = vmul.f32 %v1491_v58, %v1475_v33 }
 0x962   :  { %1125 = vst [vmem:[%s1871_s10 + $0x38] sm:$0xff] %v1117_v53 }

</bundles_post_ra>
